<compile_context>
chip_gen: v5e
topology: v5e:2x2
jax: 0.10.0
libtpu: 0.0.40
codegen_flags: <defaults>
</compile_context>

<pallas_src>
import functools

import jax
import jax.numpy as jnp
from jax.experimental import pallas as pl
from jax.experimental.pallas import tpu as pltpu


_VMEM = pl.BlockSpec(memory_space=pltpu.MemorySpace.VMEM)
_LANE = 128


# ----------------------------- fused Pallas kernel --------------------------

def _make_decoder_kernel(num_layers: int, hidden_size: int):
    """Builds the fused kernel for a fixed (static) number of layers.

    Ref layout (inputs, then outputs):
      x        (B, I)
      h0, c0   (L, B, H)
      per layer l:  w_cat_t_l (in_dim_l + H, 4H), b_l (1, 4H)
      fc_w_t   (H, O_pad)      fc_b (1, O_pad)
      probs    (B, O_pad)      h_n (L, B, H)      c_n (L, B, H)
    """
    H = hidden_size

    def kernel(*refs):
        x_ref, h0_ref, c0_ref = refs[0:3]
        layer_refs = refs[3:3 + 2 * num_layers]
        fc_w_ref = refs[3 + 2 * num_layers]
        fc_b_ref = refs[4 + 2 * num_layers]
        probs_ref, h_out_ref, c_out_ref = refs[5 + 2 * num_layers:]

        x = x_ref[...]                                   # (B, I) then (B, H)
        for layer in range(num_layers):                  # static unroll
            w_ref = layer_refs[2 * layer]                # (in_dim + H, 4H)
            b_ref = layer_refs[2 * layer + 1]            # (1, 4H)
            h_prev = h0_ref[layer]                       # (B, H)
            c_prev = c0_ref[layer]                       # (B, H)

            # Fused gate matmul: [x, h] @ [W_ih^T ; W_hh^T] + (b_ih + b_hh)
            xh = jnp.concatenate([x, h_prev], axis=1)    # (B, in_dim + H)
            gates = (
                jnp.dot(xh, w_ref[...], preferred_element_type=jnp.float32)
                + b_ref[...]
            )
            i = jax.nn.sigmoid(gates[:, 0 * H:1 * H])
            f = jax.nn.sigmoid(gates[:, 1 * H:2 * H])
            g = jnp.tanh(gates[:, 2 * H:3 * H])
            o = jax.nn.sigmoid(gates[:, 3 * H:4 * H])

            c_new = f * c_prev + i * g
            h_new = o * jnp.tanh(c_new)

            h_out_ref[layer] = h_new
            c_out_ref[layer] = c_new
            x = h_new                                    # feed next layer

        # Linear + softmax over the (lane-dense, padded) output axis.
        logits = (
            jnp.dot(x, fc_w_ref[...], preferred_element_type=jnp.float32)
            + fc_b_ref[...]
        )                                                # (B, O_pad)
        m = jnp.max(logits, axis=-1, keepdims=True)
        e = jnp.exp(logits - m)                          # padded cols -> 0
        s = jnp.sum(e, axis=-1, keepdims=True)
        probs_ref[...] = e * pl.reciprocal(s, approx=False)

    return kernel


# ------------------------------ Decoder glue --------------------------------

def init_decoder_params(key, input_size, hidden_size, output_size, num_layers):
    """Parameter init matching nn.LSTM / nn.Linear shapes, stored pre-fused."""
    params = {"layers": []}
    k = 1.0 / jnp.sqrt(jnp.float32(hidden_size))
    for layer in range(num_layers):
        in_dim = input_size if layer == 0 else hidden_size
        key, k1, k2, k3, k4 = jax.random.split(key, 5)
        w_ih = jax.random.uniform(k1, (4 * hidden_size, in_dim), jnp.float32, -k, k)
        w_hh = jax.random.uniform(k2, (4 * hidden_size, hidden_size), jnp.float32, -k, k)
        b_ih = jax.random.uniform(k3, (4 * hidden_size,), jnp.float32, -k, k)
        b_hh = jax.random.uniform(k4, (4 * hidden_size,), jnp.float32, -k, k)
        params["layers"].append({
            # fused [W_ih^T ; W_hh^T] -> (in_dim + H, 4H)
            "w_cat_t": jnp.concatenate([w_ih.T, w_hh.T], axis=0),
            "b": (b_ih + b_hh).reshape(1, 4 * hidden_size),
        })

    key, k5, k6 = jax.random.split(key, 3)
    kf = 1.0 / jnp.sqrt(jnp.float32(hidden_size))
    w_fc = jax.random.uniform(k5, (output_size, hidden_size), jnp.float32, -kf, kf)
    b_fc = jax.random.uniform(k6, (output_size,), jnp.float32, -kf, kf)

    # Lane-dense padding of the FC output axis: zero weight columns and a very
    # negative bias so padded logits contribute exp() == 0 to the softmax.
    o_pad = ((output_size + _LANE - 1) // _LANE) * _LANE
    fc_w_t = jnp.zeros((hidden_size, o_pad), jnp.float32)
    fc_w_t = fc_w_t.at[:, :output_size].set(w_fc.T)
    fc_b = jnp.full((1, o_pad), -1e30, jnp.float32)
    fc_b = fc_b.at[0, :output_size].set(b_fc)
    params["fc_w_t"] = fc_w_t                            # (H, O_pad)
    params["fc_b"] = fc_b                                # (1, O_pad)
    return params


@functools.partial(jax.jit, static_argnames=("output_size",))
def decoder_forward(params, inp, hidden, *, output_size):
    """
    inp:    (1, B, input_size)
    hidden: (h0, c0), each (num_layers, B, hidden_size)
    returns (softmax_out (1, B, output_size), (h_n, c_n))
    """
    h0, c0 = hidden
    num_layers, B, H = h0.shape
    o_pad = params["fc_w_t"].shape[1]

    flat_layer_args = []
    for lp in params["layers"]:
        flat_layer_args += [lp["w_cat_t"], lp["b"]]

    kernel = _make_decoder_kernel(num_layers, H)
    n_inputs = 3 + len(flat_layer_args) + 2

    probs_pad, h_n, c_n = pl.pallas_call(
        kernel,
        out_shape=(
            jax.ShapeDtypeStruct((B, o_pad), jnp.float32),
            jax.ShapeDtypeStruct((num_layers, B, H), jnp.float32),
            jax.ShapeDtypeStruct((num_layers, B, H), jnp.float32),
        ),
        in_specs=[_VMEM] * n_inputs,
        out_specs=(_VMEM, _VMEM, _VMEM),
    )(inp[0], h0, c0, *flat_layer_args, params["fc_w_t"], params["fc_b"])

    probs = probs_pad[:, :output_size]
    return probs[None, :, :], (h_n, c_n)


# ------------------------- Pure-JAX reference check -------------------------

def decoder_reference(params, inp, hidden, output_size):
    h0, c0 = hidden
    num_layers, B, H = h0.shape
    hi = jax.lax.Precision.HIGHEST
    x = inp[0]
    hs, cs = [], []
    for layer in range(num_layers):
        lp = params["layers"][layer]
        xh = jnp.concatenate([x, h0[layer]], axis=1)
        gates = jnp.dot(xh, lp["w_cat_t"], precision=hi) + lp["b"]
        i = jax.nn.sigmoid(gates[:, 0 * H:1 * H])
        f = jax.nn.sigmoid(gates[:, 1 * H:2 * H])
        g = jnp.tanh(gates[:, 2 * H:3 * H])
        o = jax.nn.sigmoid(gates[:, 3 * H:4 * H])
        c_new = f * c0[layer] + i * g
        h_new = o * jnp.tanh(c_new)
        hs.append(h_new)
        cs.append(c_new)
        x = h_new
    logits = (jnp.dot(x, params["fc_w_t"][:, :output_size], precision=hi)
              + params["fc_b"][:, :output_size])
    probs = jax.nn.softmax(logits, axis=-1)
    return probs[None, :, :], (jnp.stack(hs, 0), jnp.stack(cs, 0))


# ---------------------------------- main -------------------------------------

if __name__ == "__main__":
    INPUT_SIZE = 16     # N_LETTER
    HIDDEN_SIZE = 32
    OUTPUT_SIZE = 16    # N_LETTER
    NUM_LAYERS = 2
    BATCH = 2

    key = jax.random.PRNGKey(0)
    key, kp, kx, kh, kc = jax.random.split(key, 5)

    params = init_decoder_params(kp, INPUT_SIZE, HIDDEN_SIZE, OUTPUT_SIZE, NUM_LAYERS)
    inp = jax.random.normal(kx, (1, BATCH, INPUT_SIZE), jnp.float32)
    h0 = jax.random.normal(kh, (NUM_LAYERS, BATCH, HIDDEN_SIZE), jnp.float32)
    c0 = jax.random.normal(kc, (NUM_LAYERS, BATCH, HIDDEN_SIZE), jnp.float32)

    probs, (h_n, c_n) = decoder_forward(params, inp, (h0, c0),
                                        output_size=OUTPUT_SIZE)
    jax.block_until_ready((probs, h_n, c_n))

    # correctness check against pure-JAX reference
    ref_probs, (ref_h, ref_c) = decoder_reference(params, inp, (h0, c0), OUTPUT_SIZE)
    assert probs.shape == (1, BATCH, OUTPUT_SIZE)
    assert h_n.shape == (NUM_LAYERS, BATCH, HIDDEN_SIZE)
    assert c_n.shape == (NUM_LAYERS, BATCH, HIDDEN_SIZE)
    assert jnp.allclose(probs, ref_probs, atol=1e-5)
    assert jnp.allclose(h_n, ref_h, atol=1e-5)
    assert jnp.allclose(c_n, ref_c, atol=1e-5)
    # softmax rows sum to 1
    assert jnp.allclose(jnp.sum(probs, axis=-1), 1.0, atol=1e-5)

    print("KERNEL_OK")
</pallas_src>

<mosaic_0001>
module attributes {stable_mosaic.version = 11 : i64} {
  func.func @kernel(%arg0: memref<2x16xf32, #tpu.memory_space<vmem>>, %arg1: memref<2x2x32xf32, #tpu.memory_space<vmem>>, %arg2: memref<2x2x32xf32, #tpu.memory_space<vmem>>, %arg3: memref<48x128xf32, #tpu.memory_space<vmem>>, %arg4: memref<1x128xf32, #tpu.memory_space<vmem>>, %arg5: memref<64x128xf32, #tpu.memory_space<vmem>>, %arg6: memref<1x128xf32, #tpu.memory_space<vmem>>, %arg7: memref<32x128xf32, #tpu.memory_space<vmem>>, %arg8: memref<1x128xf32, #tpu.memory_space<vmem>>, %arg9: memref<2x128xf32, #tpu.memory_space<vmem>>, %arg10: memref<2x2x32xf32, #tpu.memory_space<vmem>>, %arg11: memref<2x2x32xf32, #tpu.memory_space<vmem>>) attributes {dimension_semantics = [], scalar_prefetch = 0 : i64, scratch_operands = 0 : i64, tpu.core_type = #tpu.core_type<tc>} {
    %c0 = arith.constant 0 : index
    %c0_0 = arith.constant 0 : index
    %0 = vector.load %arg0[%c0, %c0_0] : memref<2x16xf32, #tpu.memory_space<vmem>>, vector<2x16xf32>
    %c0_1 = arith.constant 0 : index
    %c0_2 = arith.constant 0 : index
    %c0_3 = arith.constant 0 : index
    %1 = vector.load %arg1[%c0_1, %c0_2, %c0_3] : memref<2x2x32xf32, #tpu.memory_space<vmem>>, vector<1x2x32xf32>
    %2 = vector.shape_cast %1 : vector<1x2x32xf32> to vector<2x32xf32>
    %c0_4 = arith.constant 0 : index
    %c0_5 = arith.constant 0 : index
    %c0_6 = arith.constant 0 : index
    %3 = vector.load %arg2[%c0_4, %c0_5, %c0_6] : memref<2x2x32xf32, #tpu.memory_space<vmem>>, vector<1x2x32xf32>
    %4 = vector.shape_cast %3 : vector<1x2x32xf32> to vector<2x32xf32>
    %5 = tpu.concatenate %0, %2 in 1 : vector<2x16xf32>, vector<2x32xf32> -> vector<2x48xf32>
    %c0_7 = arith.constant 0 : index
    %c0_8 = arith.constant 0 : index
    %6 = vector.load %arg3[%c0_7, %c0_8] : memref<48x128xf32, #tpu.memory_space<vmem>>, vector<48x128xf32>
    %cst = arith.constant dense<0.000000e+00> : vector<2x128xf32>
    %7 = tpu.matmul %5, %6, %cst {dimension_numbers = #tpu.dot_dimension_numbers<[1], [0], [0], [1], [0, 0, 1, 1], [], []>} : vector<2x48xf32>, vector<48x128xf32>, vector<2x128xf32> -> vector<2x128xf32>
    %c0_9 = arith.constant 0 : index
    %c0_10 = arith.constant 0 : index
    %8 = vector.load %arg4[%c0_9, %c0_10] : memref<1x128xf32, #tpu.memory_space<vmem>>, vector<1x128xf32>
    %9 = vector.broadcast %8 : vector<1x128xf32> to vector<2x128xf32>
    %10 = arith.addf %7, %9 : vector<2x128xf32>
    %11 = vector.extract_strided_slice %10 {offsets = [0, 0], sizes = [2, 32], strides = [1, 1]} : vector<2x128xf32> to vector<2x32xf32>
    %12 = arith.negf %11 : vector<2x32xf32>
    %13 = math.exp %12 : vector<2x32xf32>
    %cst_11 = arith.constant 1.000000e+00 : f32
    %14 = vector.broadcast %cst_11 : f32 to vector<2x32xf32>
    %15 = arith.addf %14, %13 : vector<2x32xf32>
    %16 = arith.divf %14, %15 : vector<2x32xf32>
    %17 = vector.extract_strided_slice %10 {offsets = [0, 32], sizes = [2, 32], strides = [1, 1]} : vector<2x128xf32> to vector<2x32xf32>
    %18 = arith.negf %17 : vector<2x32xf32>
    %19 = math.exp %18 : vector<2x32xf32>
    %cst_12 = arith.constant 1.000000e+00 : f32
    %20 = vector.broadcast %cst_12 : f32 to vector<2x32xf32>
    %21 = arith.addf %20, %19 : vector<2x32xf32>
    %22 = arith.divf %20, %21 : vector<2x32xf32>
    %23 = vector.extract_strided_slice %10 {offsets = [0, 64], sizes = [2, 32], strides = [1, 1]} : vector<2x128xf32> to vector<2x32xf32>
    %24 = math.tanh %23 : vector<2x32xf32>
    %25 = vector.extract_strided_slice %10 {offsets = [0, 96], sizes = [2, 32], strides = [1, 1]} : vector<2x128xf32> to vector<2x32xf32>
    %26 = arith.negf %25 : vector<2x32xf32>
    %27 = math.exp %26 : vector<2x32xf32>
    %cst_13 = arith.constant 1.000000e+00 : f32
    %28 = vector.broadcast %cst_13 : f32 to vector<2x32xf32>
    %29 = arith.addf %28, %27 : vector<2x32xf32>
    %30 = arith.divf %28, %29 : vector<2x32xf32>
    %31 = arith.mulf %22, %4 : vector<2x32xf32>
    %32 = arith.mulf %16, %24 : vector<2x32xf32>
    %33 = arith.addf %31, %32 : vector<2x32xf32>
    %34 = math.tanh %33 : vector<2x32xf32>
    %35 = arith.mulf %30, %34 : vector<2x32xf32>
    %c0_14 = arith.constant 0 : index
    %c0_15 = arith.constant 0 : index
    %c0_16 = arith.constant 0 : index
    %36 = vector.load %arg10[%c0_14, %c0_15, %c0_16] : memref<2x2x32xf32, #tpu.memory_space<vmem>>, vector<1x2x32xf32>
    %37 = vector.shape_cast %36 : vector<1x2x32xf32> to vector<2x32xf32>
    %38 = vector.shape_cast %35 : vector<2x32xf32> to vector<1x2x32xf32>
    tpu.vector_store %arg10[%c0_14, %c0_15, %c0_16], %38 {strides = array<i32>} : memref<2x2x32xf32, #tpu.memory_space<vmem>>, vector<1x2x32xf32>,
    %c0_17 = arith.constant 0 : index
    %c0_18 = arith.constant 0 : index
    %c0_19 = arith.constant 0 : index
    %39 = vector.load %arg11[%c0_17, %c0_18, %c0_19] : memref<2x2x32xf32, #tpu.memory_space<vmem>>, vector<1x2x32xf32>
    %40 = vector.shape_cast %39 : vector<1x2x32xf32> to vector<2x32xf32>
    %41 = vector.shape_cast %33 : vector<2x32xf32> to vector<1x2x32xf32>
    tpu.vector_store %arg11[%c0_17, %c0_18, %c0_19], %41 {strides = array<i32>} : memref<2x2x32xf32, #tpu.memory_space<vmem>>, vector<1x2x32xf32>,
    %c1 = arith.constant 1 : index
    %c0_20 = arith.constant 0 : index
    %c0_21 = arith.constant 0 : index
    %42 = vector.load %arg1[%c1, %c0_20, %c0_21] : memref<2x2x32xf32, #tpu.memory_space<vmem>>, vector<1x2x32xf32>
    %43 = vector.shape_cast %42 : vector<1x2x32xf32> to vector<2x32xf32>
    %c1_22 = arith.constant 1 : index
    %c0_23 = arith.constant 0 : index
    %c0_24 = arith.constant 0 : index
    %44 = vector.load %arg2[%c1_22, %c0_23, %c0_24] : memref<2x2x32xf32, #tpu.memory_space<vmem>>, vector<1x2x32xf32>
    %45 = vector.shape_cast %44 : vector<1x2x32xf32> to vector<2x32xf32>
    %46 = tpu.concatenate %35, %43 in 1 : vector<2x32xf32>, vector<2x32xf32> -> vector<2x64xf32>
    %c0_25 = arith.constant 0 : index
    %c0_26 = arith.constant 0 : index
    %47 = vector.load %arg5[%c0_25, %c0_26] : memref<64x128xf32, #tpu.memory_space<vmem>>, vector<64x128xf32>
    %cst_27 = arith.constant dense<0.000000e+00> : vector<2x128xf32>
    %48 = tpu.matmul %46, %47, %cst_27 {dimension_numbers = #tpu.dot_dimension_numbers<[1], [0], [0], [1], [0, 0, 1, 1], [], []>} : vector<2x64xf32>, vector<64x128xf32>, vector<2x128xf32> -> vector<2x128xf32>
    %c0_28 = arith.constant 0 : index
    %c0_29 = arith.constant 0 : index
    %49 = vector.load %arg6[%c0_28, %c0_29] : memref<1x128xf32, #tpu.memory_space<vmem>>, vector<1x128xf32>
    %50 = vector.broadcast %49 : vector<1x128xf32> to vector<2x128xf32>
    %51 = arith.addf %48, %50 : vector<2x128xf32>
    %52 = vector.extract_strided_slice %51 {offsets = [0, 0], sizes = [2, 32], strides = [1, 1]} : vector<2x128xf32> to vector<2x32xf32>
    %53 = arith.negf %52 : vector<2x32xf32>
    %54 = math.exp %53 : vector<2x32xf32>
    %cst_30 = arith.constant 1.000000e+00 : f32
    %55 = vector.broadcast %cst_30 : f32 to vector<2x32xf32>
    %56 = arith.addf %55, %54 : vector<2x32xf32>
    %57 = arith.divf %55, %56 : vector<2x32xf32>
    %58 = vector.extract_strided_slice %51 {offsets = [0, 32], sizes = [2, 32], strides = [1, 1]} : vector<2x128xf32> to vector<2x32xf32>
    %59 = arith.negf %58 : vector<2x32xf32>
    %60 = math.exp %59 : vector<2x32xf32>
    %cst_31 = arith.constant 1.000000e+00 : f32
    %61 = vector.broadcast %cst_31 : f32 to vector<2x32xf32>
    %62 = arith.addf %61, %60 : vector<2x32xf32>
    %63 = arith.divf %61, %62 : vector<2x32xf32>
    %64 = vector.extract_strided_slice %51 {offsets = [0, 64], sizes = [2, 32], strides = [1, 1]} : vector<2x128xf32> to vector<2x32xf32>
    %65 = math.tanh %64 : vector<2x32xf32>
    %66 = vector.extract_strided_slice %51 {offsets = [0, 96], sizes = [2, 32], strides = [1, 1]} : vector<2x128xf32> to vector<2x32xf32>
    %67 = arith.negf %66 : vector<2x32xf32>
    %68 = math.exp %67 : vector<2x32xf32>
    %cst_32 = arith.constant 1.000000e+00 : f32
    %69 = vector.broadcast %cst_32 : f32 to vector<2x32xf32>
    %70 = arith.addf %69, %68 : vector<2x32xf32>
    %71 = arith.divf %69, %70 : vector<2x32xf32>
    %72 = arith.mulf %63, %45 : vector<2x32xf32>
    %73 = arith.mulf %57, %65 : vector<2x32xf32>
    %74 = arith.addf %72, %73 : vector<2x32xf32>
    %75 = math.tanh %74 : vector<2x32xf32>
    %76 = arith.mulf %71, %75 : vector<2x32xf32>
    %c1_33 = arith.constant 1 : index
    %c0_34 = arith.constant 0 : index
    %c0_35 = arith.constant 0 : index
    %77 = vector.load %arg10[%c1_33, %c0_34, %c0_35] : memref<2x2x32xf32, #tpu.memory_space<vmem>>, vector<1x2x32xf32>
    %78 = vector.shape_cast %77 : vector<1x2x32xf32> to vector<2x32xf32>
    %79 = vector.shape_cast %76 : vector<2x32xf32> to vector<1x2x32xf32>
    tpu.vector_store %arg10[%c1_33, %c0_34, %c0_35], %79 {strides = array<i32>} : memref<2x2x32xf32, #tpu.memory_space<vmem>>, vector<1x2x32xf32>,
    %c1_36 = arith.constant 1 : index
    %c0_37 = arith.constant 0 : index
    %c0_38 = arith.constant 0 : index
    %80 = vector.load %arg11[%c1_36, %c0_37, %c0_38] : memref<2x2x32xf32, #tpu.memory_space<vmem>>, vector<1x2x32xf32>
    %81 = vector.shape_cast %80 : vector<1x2x32xf32> to vector<2x32xf32>
    %82 = vector.shape_cast %74 : vector<2x32xf32> to vector<1x2x32xf32>
    tpu.vector_store %arg11[%c1_36, %c0_37, %c0_38], %82 {strides = array<i32>} : memref<2x2x32xf32, #tpu.memory_space<vmem>>, vector<1x2x32xf32>,
    %c0_39 = arith.constant 0 : index
    %c0_40 = arith.constant 0 : index
    %83 = vector.load %arg7[%c0_39, %c0_40] : memref<32x128xf32, #tpu.memory_space<vmem>>, vector<32x128xf32>
    %cst_41 = arith.constant dense<0.000000e+00> : vector<2x128xf32>
    %84 = tpu.matmul %76, %83, %cst_41 {dimension_numbers = #tpu.dot_dimension_numbers<[1], [0], [0], [1], [0, 0, 1, 1], [], []>} : vector<2x32xf32>, vector<32x128xf32>, vector<2x128xf32> -> vector<2x128xf32>
    %c0_42 = arith.constant 0 : index
    %c0_43 = arith.constant 0 : index
    %85 = vector.load %arg8[%c0_42, %c0_43] : memref<1x128xf32, #tpu.memory_space<vmem>>, vector<1x128xf32>
    %86 = vector.broadcast %85 : vector<1x128xf32> to vector<2x128xf32>
    %87 = arith.addf %84, %86 : vector<2x128xf32>
    %cst_44 = arith.constant dense<0xFF800000> : vector<2xf32>
    %88 = vector.multi_reduction <maximumf>, %87, %cst_44 [1] : vector<2x128xf32> to vector<2xf32>
    %89 = vector.shape_cast %88 : vector<2xf32> to vector<2x1xf32>
    %90 = vector.broadcast %89 : vector<2x1xf32> to vector<2x128xf32>
    %91 = arith.subf %87, %90 : vector<2x128xf32>
    %92 = math.exp %91 : vector<2x128xf32>
    %cst_45 = arith.constant dense<0.000000e+00> : vector<2xf32>
    %93 = vector.multi_reduction <add>, %92, %cst_45 [1] : vector<2x128xf32> to vector<2xf32>
    %94 = vector.shape_cast %93 : vector<2xf32> to vector<2x1xf32>
    %95 = tpu.reciprocal %94 : vector<2x1xf32> -> vector<2x1xf32>
    %96 = vector.broadcast %95 : vector<2x1xf32> to vector<2x128xf32>
    %97 = arith.mulf %92, %96 : vector<2x128xf32>
    %c0_46 = arith.constant 0 : index
    %c0_47 = arith.constant 0 : index
    %98 = vector.load %arg9[%c0_46, %c0_47] : memref<2x128xf32, #tpu.memory_space<vmem>>, vector<2x128xf32>
    tpu.vector_store %arg9[%c0_46, %c0_47], %97 {strides = array<i32>} : memref<2x128xf32, #tpu.memory_space<vmem>>, vector<2x128xf32>,
    return
  }
}

</mosaic_0001>

<bundles_post_ra>
// kernel: decoder_forward.1
= control target key start
LH: loop header
LB: loop body
LE: loop exit
PB: predicated region body
PF: predicated region fallthrough
CT: control target
= control target key end

     0   :  { %17 = vsyncpa [#allocation3], 0  ;;  %s849_s0 = inlined_call_operand.hbm [shape: f32[2,16], index: 0, kind: input, shape index: {}]   ;;  %s850_s1 = inlined_call_operand.vmem [shape: f32[2,2,32], index: 1, kind: input, shape index: {}]   ;;  %s851_s2 = inlined_call_operand.vmem [shape: f32[2,2,32], index: 2, kind: input, shape index: {}]   ;;  %s852_s3 = inlined_call_operand.hbm [shape: f32[48,128], index: 3, kind: input, shape index: {}]   ;;  %s853_s4 = inlined_call_operand.hbm [shape: f32[1,128], index: 4, kind: input, shape index: {}]   ;;  %s854_s5 = inlined_call_operand.hbm [shape: f32[64,128], index: 5, kind: input, shape index: {}]   ;;  %s855_s6 = inlined_call_operand.hbm [shape: f32[1,128], index: 6, kind: input, shape index: {}]   ;;  %s856_s7 = inlined_call_operand.hbm [shape: f32[32,128], index: 7, kind: input, shape index: {}]   ;;  %s857_s8 = inlined_call_operand.hbm [shape: f32[1,128], index: 8, kind: input, shape index: {}]   ;;  %s858_s9 = inlined_call_operand.vmem [shape: f32[2,128], index: 9, kind: output, shape index: {0}]   ;;  %s859_s10 = inlined_call_operand.hbm [shape: f32[2,2,32], index: 10, kind: output, shape index: {1}]   ;;  %s860_s11 = inlined_call_operand.hbm [shape: f32[2,2,32], index: 11, kind: output, shape index: {2}]  }
   0x1   :  { %18 = vsyncpa [#allocation6], 0 }
   0x2   :  { %19 = vsyncpa [#allocation9], 0 }
   0x3   :  { %20 = vsyncpa [#allocation12], 0 }
   0x4   :  { %21 = vsyncpa [#allocation4], 0  ;;  %s42_s19 = sshll.u32 %s852_s3, 4  ;;  %s43_s19 = int_to_ptr.hbm [resolvable:$true] %s42_s19 }
   0x5   :  { %22 = vsyncpa [#allocation16], 0  ;;  %s706_s20 = smov [#allocation5]   ;;  %s66_s24 = sshll.u32 %s854_s5, 4  ;;  %s67_s24 = int_to_ptr.hbm [resolvable:$true] %s66_s24 }
   0x6   :  { %s44_s21 = sshll.u32 %s706_s20, 4  ;;  %s707_s25 = smov 128   ;;  %s45_s21 = int_to_ptr.vmem [resolvable:$true] %s44_s21 }
   0x7   :  { %s708_s26 = smov 8   ;;  %s709_s27 = smov [#allocation8]  }
   0x8   :  { %50 = dma.hbm_to_vmem [thread:$0]  %s43_s19, 768, %s45_s21, [#allocation6], %s707_s25, %s707_s25, %s708_s26  }
   0x9   :  { %s68_s28 = sshll.u32 %s709_s27, 4  ;;  %s90_s12 = sshll.u32 %s856_s7, 4  ;;  %s69_s28 = int_to_ptr.vmem [resolvable:$true] %s68_s28  ;;  %s91_s12 = int_to_ptr.hbm [resolvable:$true] %s90_s12 }
   0xa   :  { %74 = dma.hbm_to_vmem [thread:$0]  %s67_s24, 1024, %s69_s28, [#allocation9], %s707_s25, %s707_s25, %s708_s26  }
   0xb   :  { %s28_s14 = sshll.u32 %s849_s0, 4  ;;  %s710_s15 = smov [#allocation11]   ;;  %s29_s14 = int_to_ptr.hbm [resolvable:$true] %s28_s14 }
   0xc   :  { %s92_s16 = sshll.u32 %s710_s15, 4  ;;  %s711_s5 = smov [#allocation2]   ;;  %s93_s16 = int_to_ptr.vmem [resolvable:$true] %s92_s16 }
   0xd   :  { %98 = dma.hbm_to_vmem [thread:$0]  %s91_s12, 512, %s93_s16, [#allocation12], %s707_s25, %s707_s25, %s708_s26  }
   0xe   :  { %s30_s17 = sshll.u32 %s711_s5, 4  ;;  %s56_s20 = sshll.u32 %s853_s4, 4  ;;  %s31_s17 = int_to_ptr.vmem [resolvable:$true] %s30_s17  ;;  %s57_s20 = int_to_ptr.hbm [resolvable:$true] %s56_s20 }
   0xf   :  { %33 = dma.hbm_to_vmem [thread:$0]  %s29_s14, 32, %s31_s17, [#allocation3]  }
  0x10   :  { %s80_s22 = sshll.u32 %s855_s6, 4  ;;  %s712_s23 = smov [#allocation7]   ;;  %s81_s22 = int_to_ptr.hbm [resolvable:$true] %s80_s22 }
  0x11   :  { %s58_s0 = sshll.u32 %s712_s23, 4  ;;  %s713_s24 = smov [#allocation10]   ;;  %s59_s0 = int_to_ptr.vmem [resolvable:$true] %s58_s0 }
  0x12   :  { %61 = dma.hbm_to_vmem [thread:$0]  %s57_s20, 16, %s59_s0, [#allocation6]  }
  0x13   :  { %s82_s25 = sshll.u32 %s713_s24, 4  ;;  %s104_s28 = sshll.u32 %s857_s8, 4  ;;  %s83_s25 = int_to_ptr.vmem [resolvable:$true] %s82_s25  ;;  %s105_s28 = int_to_ptr.hbm [resolvable:$true] %s104_s28 }
  0x14   :  { %85 = dma.hbm_to_vmem [thread:$0]  %s81_s22, 16, %s83_s25, [#allocation9]  }
  0x15   :  { %s714_s4 = smov [#allocation13]  }
  0x16   :  { %s106_s29 = sshll.u32 %s714_s4, 4  ;;  %s107_s29 = int_to_ptr.vmem [resolvable:$true] %s106_s29 }
  0x17   :  { %109 = dma.hbm_to_vmem [thread:$0]  %s105_s28, 16, %s107_s29, [#allocation12]  }
  0x18   :  { %694 = dma.done.wait [#allocation3], 32  }
  0x19   :  { %695 = vsyncadd [#allocation3], 4294967264 }
  0x1a   :  { %696 = dma.done.wait [#allocation6], 784  }
  0x1b   :  { %697 = vsyncadd [#allocation6], 4294966512 }
  0x1c   :  { %698 = dma.done.wait [#allocation9], 1040  }
  0x1d   :  { %699 = vsyncadd [#allocation9], 4294966256 }
  0x1e   :  { %700 = dma.done.wait [#allocation12], 528  }
  0x1f   :  { %701 = vsyncadd [#allocation12], 4294966768  ;;  %v139_v0 = vld [vmem:[%s850_s1] sm:$0x3]  ;;  %v152_v1 = vld [vmem:[#allocation5 + $0x28] sm:$0xff]  ;;  %s715_s8 = smov 16  }
  0x20   :  { %v151_v2 = vld [vmem:[#allocation5 + $0x20] sm:$0xff]  ;;  %142 = vrot.lane.b32.xlu0 %v139_v0, %s715_s8  ;;  %171 = vmatpush.msra.mxu0 %v152_v1  ;;  %v150_v3 = vld [vmem:[#allocation5 + $0x18] sm:$0xff]  ;;  %v149_v4 = vld [vmem:[#allocation5 + $0x10] sm:$0xff]  ;;  %s716_s13 = smov 32   ;;  %vm145_vm0 = vcmask 130048   ;;  %vm157_vm1 = vcmask 392192  }
  0x21   :  { %v148_v5 = vld [vmem:[#allocation5 + $0x8] sm:$0xff]  ;;  %v147_v6 = vld [vmem:[#allocation5] sm:$0xff]  ;;  %v140_v7 = vld [vmem:[%s851_s2] sm:$0x3]  ;;  %s717_s14 = smov 64   ;;  %vm226_vm6 = vcmask 254976  }
  0x22   :  { %172 = vmatpush.msra.mxu0 %v151_v2  ;;  %202 = vrot.lane.b32.xlu1 %v140_v7, %s716_s13  ;;  %v138_v8 = vld [vmem:[#allocation2] sm:$0x3]  ;;  %v455_v11 = vld [vmem:[#allocation7] ss:$0 sm:$0xff]  ;;  %v434_v30 = vld [vmem:[%s850_s1 + $0x2] sm:$0x3] }
  0x23   :  { %v250_v36 = vld [vmem:[#allocation8 + $0x38] sm:$0xff]  ;;  %v249_v37 = vld [vmem:[#allocation8 + $0x30] sm:$0xff]  ;;  %v248_v38 = vld [vmem:[#allocation8 + $0x28] sm:$0xff]  ;;  %vm241_vm7 = vcmask 261120   ;;  %vm255_vm8 = vcmask 523264   ;;  %vm362_vm13 = vcmask 1041408  }
  0x24   :  { %173 = vmatpush.msra.mxu0 %v150_v3  ;;  %267 = vmatpush.msra.mxu1 %v250_v36  ;;  %v247_v39 = vld [vmem:[#allocation8 + $0x20] sm:$0xff]  ;;  %v246_v40 = vld [vmem:[#allocation8 + $0x18] sm:$0xff]  ;;  %v245_v41 = vld [vmem:[#allocation8 + $0x10] sm:$0xff]  ;;  %s719_s17 = smov [#allocation14]   ;;  %s396_s7 = sshll.u32 %s859_s10, 4  ;;  %s397_s7 = int_to_ptr.hbm [resolvable:$true] %s396_s7 }
  0x25   :  { %v244_v42 = vld [vmem:[#allocation8 + $0x8] sm:$0xff]  ;;  %v243_v45 = vld [vmem:[#allocation8] sm:$0xff]  ;;  %s394_s18 = sshll.u32 %s719_s17, 4  ;;  %s720_s21 = smov [#allocation15]   ;;  %s395_s18 = int_to_ptr.vmem [resolvable:$true] %s394_s18 }
  0x26   :  { %174 = vmatpush.msra.mxu0 %v149_v4  ;;  %268 = vmatpush.msra.mxu1 %v249_v37  ;;  %v435_v46 = vld [vmem:[%s851_s2 + $0x2] sm:$0x3]  ;;  %v456_v50 = vld [vmem:[#allocation10] ss:$0 sm:$0xff]  ;;  %s718_s2 = smov 96   ;;  %s407_s22 = sshll.u32 %s720_s21, 4  ;;  %s408_s22 = int_to_ptr.vmem [resolvable:$true] %s407_s22 }
  0x27   :  { %s721_s23 = smov 2   ;;  %s409_s25 = sshll.u32 %s860_s11, 4  ;;  %s410_s25 = int_to_ptr.hbm [resolvable:$true] %s409_s25 }
  0x28   :  { %175 = vmatpush.msra.mxu0 %v148_v5  ;;  %269 = vmatpush.msra.mxu1 %v248_v38 }
  0x2a   :  { %176 = vmatpush.msra.mxu0 %v147_v6  ;;  %270 = vmatpush.msra.mxu1 %v247_v39 }
  0x2c   :  { %271 = vmatpush.msra.mxu1 %v246_v40 }
  0x2e   :  { %272 = vmatpush.msra.mxu1 %v245_v41 }
  0x30   :  { %273 = vmatpush.msra.mxu1 %v244_v42 }
  0x32   :  { %274 = vmatpush.msra.mxu1 %v243_v45 }
  0x92   :  { %v143_v9 = vpop.permute.xlu0 %142 }
  0x93   :  { %v146_v10 = vsel %vm145_vm0, %v138_v8, %v143_v9 }
  0x94   :  { %432 = vmatmul.msk.f32.vlgmr.msra.gmra.mxu0 %vm157_vm1, %v146_v10  ;;  %v203_v31 = vpop.permute.xlu1 %202  ;;  %v335_v10 = vld [vmem:[#allocation11 + $0x18] sm:$0xff] }
  0x95   :  { %354 = vmatpush.msra.mxu2 %v335_v10 }
 0x111   :  { %v178_v12 = vpop.f32.mrf.mxu0 }
 0x112   :  { %v179_v13 = vadd.f32 %v455_v11, %v178_v12  ;;  %v334_v11 = vld [vmem:[#allocation11 + $0x10] sm:$0xff]  ;;  %v333_v12 = vld [vmem:[#allocation11 + $0x8] sm:$0xff] }
 0x113   :  { %355 = vmatpush.msra.mxu2 %v334_v11 }
 0x114   :  { %458 = vtanh.f32 %v179_v13  ;;  %v433_v15 = vmul.f32 -1.442695, %v179_v13  ;;  %v332_v13 = vld [vmem:[#allocation11] sm:$0xff] }
 0x115   :  { %356 = vmatpush.msra.mxu2 %v333_v12 }
 0x116   :  { %460 = vpow2.f32 %v433_v15 }
 0x117   :  { %357 = vmatpush.msra.mxu2 %v332_v13 }
 0x11a   :  { %v459_v14 = vpop.eup %458 }
 0x11b   :  { %207 = vrot.lane.b32.xlu0 %v459_v14, %s717_s14 }
 0x11c   :  { %v461_v16 = vpop.eup %460 }
 0x11d   :  { %v184_v17 = vadd.f32 1.0, %v461_v16 }
 0x11f   :  { %462 = vrcp.f32 %v184_v17  ;;  %v196_v23 = vand.u32 2147483648, %v184_v17  ;;  %vm190_vm3 = vweird.f32 %v184_v17  ;;  %v194_v24 = vand.u32 2147483647, %v184_v17 }
 0x121   :  { %v197_v26 = vor.u32 1.1754944e-38, %v196_v23  ;;  %vm195_vm5 = vcmp.eq.f32.partialorder %v194_v24, 8.507059e+37 }
 0x123   :  { %238 = vrot.lane.b32.xlu0 %v434_v30, %s716_s13 }
 0x125   :  { %v463_v18 = vpop.eup %462 }
 0x126   :  { %v186_v19 = vmul.f32 %v463_v18, %v184_v17  ;;  %vm191_vm2 = vweird.f32 %v463_v18 }
 0x127   :  { %vm192_vm4 = vmor %vm190_vm3, %vm191_vm2 }
 0x128   :  { %v187_v20 = vsub.f32 1.0, %v186_v19  ;;  %v457_v19 = vld [vmem:[#allocation13] ss:$0 sm:$0xff] }
 0x12a   :  { %v188_v21 = vmul.f32 %v463_v18, %v187_v20 }
 0x12c   :  { %v189_v22 = vadd.f32 %v463_v18, %v188_v21 }
 0x12e   :  { %v193_v25 = vsel %vm192_vm4, %v463_v18, %v189_v22 }
 0x12f   :  { %v198_v27 = vsel %vm195_vm5, %v197_v26, %v193_v25 }
 0x130   :  { %v205_v32 = vmul.f32 %v203_v31, %v198_v27 }
 0x18d   :  { %v208_v28 = vpop.permute.xlu0 %207 }
 0x18e   :  { %v210_v29 = vmul.f32 %v208_v28, %v198_v27 }
 0x190   :  { %212 = vrot.lane.b32.xlu1 %v210_v29, %s716_s13 }
 0x195   :  { %v239_v47 = vpop.permute.xlu0 %238 }
 0x202   :  { %v213_v33 = vpop.permute.xlu1 %212 }
 0x203   :  { %v816_v34 = vadd.f32 %v213_v33, %v205_v32 }
 0x205   :  { %464 = vtanh.f32 %v816_v34 }
 0x20b   :  { %v465_v35 = vpop.eup %464 }
 0x20c   :  { %218 = vrot.lane.b32.xlu2 %v465_v35, %s717_s14 }
 0x266   :  { %v219_v43 = vpop.permute.xlu2 %218 }
 0x267   :  { %v221_v44 = vmul.f32 %v219_v43, %v198_v27 }
 0x269   :  { %223 = vrot.lane.b32.xlu2 %v221_v44, %s716_s13 }
 0x271   :  { %300 = vrot.lane.b32.xlu2 %v435_v46, %s716_s13 }
 0x2c3   :  { %v224_v48 = vpop.permute.xlu2 %223 }
 0x2c4   :  { %227 = vst.msk [vmem:[#allocation14] sm:$0x3] %vm226_vm6, %v224_v48  ;;  %v242_v49 = vsel %vm241_vm7, %v224_v48, %v239_v47 }
 0x2c5   :  { %436 = vmatmul.msk.f32.vlgmr.msra.gmra.mxu1 %vm255_vm8, %v242_v49 }
 0x2cb   :  { %v301_v5 = vpop.permute.xlu2 %300 }
 0x342   :  { %v276_v51 = vpop.f32.mrf.mxu1 }
 0x343   :  { %v277_v52 = vadd.f32 %v456_v50, %v276_v51 }
 0x345   :  { %466 = vtanh.f32 %v277_v52  ;;  %v437_v54 = vmul.f32 -1.442695, %v277_v52 }
 0x347   :  { %468 = vpow2.f32 %v437_v54 }
 0x34b   :  { %v467_v53 = vpop.eup %466 }
 0x34c   :  { %305 = vrot.lane.b32.xlu1 %v467_v53, %s717_s14 }
 0x34d   :  { %v469_v55 = vpop.eup %468 }
 0x34e   :  { %v282_v56 = vadd.f32 1.0, %v469_v55 }
 0x350   :  { %470 = vrcp.f32 %v282_v56  ;;  %v294_v62 = vand.u32 2147483648, %v282_v56  ;;  %vm288_vm10 = vweird.f32 %v282_v56  ;;  %v292_v63 = vand.u32 2147483647, %v282_v56 }
 0x352   :  { %v295_v1 = vor.u32 1.1754944e-38, %v294_v62  ;;  %vm293_vm12 = vcmp.eq.f32.partialorder %v292_v63, 8.507059e+37 }
 0x356   :  { %v471_v57 = vpop.eup %470 }
 0x357   :  { %v284_v58 = vmul.f32 %v471_v57, %v282_v56  ;;  %vm289_vm9 = vweird.f32 %v471_v57 }
 0x358   :  { %vm290_vm11 = vmor %vm288_vm10, %vm289_vm9 }
 0x359   :  { %v285_v59 = vsub.f32 1.0, %v284_v58 }
 0x35b   :  { %v286_v60 = vmul.f32 %v471_v57, %v285_v59 }
 0x35d   :  { %v287_v61 = vadd.f32 %v471_v57, %v286_v60 }
 0x35f   :  { %v291_v0 = vsel %vm290_vm11, %v471_v57, %v287_v61 }
 0x360   :  { %v296_v2 = vsel %vm293_vm12, %v295_v1, %v291_v0 }
 0x361   :  { %v303_v6 = vmul.f32 %v301_v5, %v296_v2 }
 0x3be   :  { %v306_v3 = vpop.permute.xlu1 %305 }
 0x3bf   :  { %v308_v4 = vmul.f32 %v306_v3, %v296_v2 }
 0x3c1   :  { %310 = vrot.lane.b32.xlu0 %v308_v4, %s716_s13 }
 0x433   :  { %v311_v7 = vpop.permute.xlu0 %310 }
 0x434   :  { %v313_v8 = vadd.f32 %v311_v7, %v303_v6 }
 0x436   :  { %472 = vtanh.f32 %v313_v8 }
 0x43c   :  { %v473_v9 = vpop.eup %472 }
 0x43d   :  { %316 = vrot.lane.b32.xlu1 %v473_v9, %s717_s14 }
 0x4af   :  { %v317_v14 = vpop.permute.xlu1 %316 }
 0x4b0   :  { %v319_v15 = vmul.f32 %v317_v14, %v296_v2 }
 0x4b2   :  { %321 = vrot.lane.b32.xlu2 %v319_v15, %s716_s13 }
 0x4ba   :  { %229 = vrot.lane.b32.xlu2 %v816_v34, %s718_s2 }
 0x4c2   :  { %327 = vrot.lane.b32.xlu2 %v313_v8, %s718_s2 }
 0x50c   :  { %v322_v16 = vpop.permute.xlu2 %321 }
 0x50d   :  { %325 = vst.msk [vmem:[#allocation14 + $0x2] sm:$0x3] %vm226_vm6, %v322_v16  ;;  %438 = vmatmul.msk.f32.vlgmr.msra.gmra.mxu2 %vm241_vm7, %v322_v16 }
 0x50e   :  { %402 = dma.vmem_to_hbm [thread:$0]  %s395_s18, 64, %s397_s7, [#allocation4], %s716_s13, %s716_s13, %s721_s23  }
 0x514   :  { %v230_v17 = vpop.permute.xlu2 %229 }
 0x515   :  { %232 = vst.msk [vmem:[#allocation15] sm:$0x3] %vm226_vm6, %v230_v17 }
 0x51c   :  { %v328_v18 = vpop.permute.xlu2 %327 }
 0x51d   :  { %331 = vst.msk [vmem:[#allocation15 + $0x2] sm:$0x3] %vm226_vm6, %v328_v18 }
 0x51e   :  { %415 = dma.vmem_to_hbm [thread:$0]  %s408_s22, 64, %s410_s25, [#allocation16], %s716_s13, %s716_s13, %s721_s23  }
 0x590   :  { %v359_v20 = vpop.f32.mrf.mxu2 }
 0x591   :  { %v360_v21 = vadd.f32 %v457_v19, %v359_v20 }
 0x593   :  { %v363_v22 = vsel %vm362_vm13, %v360_v21, -inf }
 0x594   :  { %364 = vmax.xlane.f32.xlu0 %v363_v22 }
 0x607   :  { %v365_v23 = vpop.xlane.xlu0 %364 }
 0x608   :  { %v366_v24 = vsub.f32 %v360_v21, %v365_v23 }
 0x60a   :  { %v367_v25 = vmul.f32 1.442695, %v366_v24 }
 0x60c   :  { %474 = vpow2.f32 %v367_v25 }
 0x612   :  { %v475_v26 = vpop.eup %474 }
 0x613   :  { %v369_v27 = vsel %vm362_vm13, %v475_v26, 0.0 }
 0x614   :  { %370 = vadd.xlane.f32.xlu1 %v369_v27 }
 0x687   :  { %v371_v28 = vpop.xlane.xlu1 %370 }
 0x688   :  { %476 = vrcp.f32 %v371_v28  ;;  %v383_v32 = vand.u32 2147483648, %v371_v28  ;;  %v381_v34 = vand.u32 2147483647, %v371_v28  ;;  %vm377_vm15 = vweird.f32 %v371_v28 }
 0x68a   :  { %v384_v36 = vor.u32 1.1754944e-38, %v383_v32  ;;  %vm382_vm1 = vcmp.eq.f32.partialorder %v381_v34, 8.507059e+37 }
 0x68e   :  { %v477_v29 = vpop.eup %476 }
 0x68f   :  { %v373_v30 = vmul.f32 %v477_v29, %v371_v28  ;;  %vm378_vm14 = vweird.f32 %v477_v29 }
 0x690   :  { %vm379_vm0 = vmor %vm377_vm15, %vm378_vm14 }
 0x691   :  { %v374_v31 = vsub.f32 1.0, %v373_v30 }
 0x693   :  { %v375_v33 = vmul.f32 %v477_v29, %v374_v31 }
 0x695   :  { %v376_v35 = vadd.f32 %v477_v29, %v375_v33 }
 0x697   :  { %v380_v37 = vsel %vm379_vm0, %v477_v29, %v376_v35 }
 0x698   :  { %v385_v38 = vsel %vm382_vm1, %v384_v36, %v380_v37 }
 0x699   :  { %v386_v39 = vmul.f32 %v475_v26, %v385_v38 }
 0x69b   :  { %387 = vst [vmem:[%s858_s9] sm:$0x3] %v386_v39 }
 0x69c   :  { %702 = dma.done.wait [#allocation4], 64  }
 0x69d   :  { %703 = vsyncadd [#allocation4], 4294967232 }
 0x69e   :  { %704 = dma.done.wait [#allocation16], 64  }
 0x69f   :  { %705 = vsyncadd [#allocation16], 4294967232 }
 0x6a0   :  { %426 = vsyncpa [#allocation3], 1 }
 0x6a1   :  { %427 = vsyncpa [#allocation6], 1 }
 0x6a2   :  { %428 = vsyncpa [#allocation9], 1 }
 0x6a3   :  { %429 = vsyncpa [#allocation12], 1 }
 0x6a4   :  { %430 = vsyncpa [#allocation4], 1 }
 0x6a5   :  { %431 = vsyncpa [#allocation16], 1 }

</bundles_post_ra>
